<compile_context>
chip_gen: v5e
topology: v5e:2x2
jax: 0.10.0
libtpu: 0.0.40
codegen_flags: <defaults>
</compile_context>

<pallas_src>
import functools

import jax
import jax.numpy as jnp
from jax.experimental import pallas as pl
from jax.experimental.pallas import tpu as pltpu


# ---------------------------------------------------------------------------
# Kernels (batch-major: activations carried as (B, hid))
# ---------------------------------------------------------------------------

def _disc_kernel_blocks(x_ref, w1t_ref, head_ref, wblkt_ref, blkrow_ref,
                        out_ref, *, clamp_magnitude, bn_eps):
    B = x_ref.shape[0]
    inv_b = 1.0 / B

    head = head_ref[...]                              # (3, hid): b1, wlast, blast
    b1 = head[0:1, :]
    wlast = head[1:2, :]
    blast = head[2:3, 0:1]                            # (1, 1) scalar tile

    # first_fc: weights are stored pre-transposed (in, hid) -> plain matmul.
    h = jnp.dot(x_ref[...], w1t_ref[...],
                preferred_element_type=jnp.float32) + b1      # (B, hid)

    # Residual blocks: h = h + ReLU(BN(h @ W^T + b)).
    # Static unroll is fine for the module's small num_blocks; switch to
    # lax.fori_loop / a grid axis if configured with many/wide blocks.
    num_blocks = wblkt_ref.shape[0]                   # static
    for i in range(num_blocks):
        rows = blkrow_ref[i]                          # (3, hid): bias, gamma, beta
        z = jnp.dot(h, wblkt_ref[i],
                    preferred_element_type=jnp.float32) + rows[0:1, :]
        # BatchNorm1d training-mode stats over the batch (sublane) axis,
        # two-pass centered variance (matches PyTorch, no cancellation).
        mean = jnp.sum(z, axis=0, keepdims=True) * inv_b
        d = z - mean
        var = jnp.sum(d * d, axis=0, keepdims=True) * inv_b
        zh = d * jax.lax.rsqrt(var + bn_eps)
        zh = zh * rows[1:2, :] + rows[2:3, :]
        h = h + jnp.maximum(zh, 0.0)                  # ReLU + residual add

    # last_fc (out width 1): VPU multiply + lane reduction (no N=1 MXU matmul).
    o = jnp.sum(h * wlast, axis=1, keepdims=True) + blast     # (B, 1)
    out_ref[...] = jnp.clip(o, -clamp_magnitude, clamp_magnitude)


def _disc_kernel_noblocks(x_ref, w1t_ref, head_ref, out_ref, *,
                          clamp_magnitude):
    head = head_ref[...]
    h = jnp.dot(x_ref[...], w1t_ref[...],
                preferred_element_type=jnp.float32) + head[0:1, :]
    o = jnp.sum(h * head[1:2, :], axis=1, keepdims=True) + head[2:3, 0:1]
    out_ref[...] = jnp.clip(o, -clamp_magnitude, clamp_magnitude)


# ---------------------------------------------------------------------------
# Parameter packing (call ONCE per parameter set, cached across forward calls)
# ---------------------------------------------------------------------------

def pack_params(params):
    hid = params["w1"].shape[0]
    head = jnp.concatenate(
        [params["b1"].reshape(1, hid),
         params["wlast"].reshape(1, hid),
         jnp.full((1, hid), params["blast"].reshape(()), jnp.float32)],
        axis=0).astype(jnp.float32)                           # (3, hid)
    packed = {
        "w1t": params["w1"].T.astype(jnp.float32),            # (in, hid)
        "head": head,
    }
    nb = params["wblk"].shape[0]
    if nb > 0:
        packed["wblkt"] = jnp.swapaxes(params["wblk"], 1, 2).astype(jnp.float32)
        packed["blk_rows"] = jnp.stack(
            [params["bblk"].reshape(nb, hid),
             params["gamma"].reshape(nb, hid),
             params["beta"].reshape(nb, hid)],
            axis=1).astype(jnp.float32)                        # (nb, 3, hid)
    return packed


# ---------------------------------------------------------------------------
# Forward wrapper
# ---------------------------------------------------------------------------

def resnet_airl_disc_forward(batch, packed, *, clamp_magnitude=10.0,
                             bn_eps=1e-5):
    """batch: [B, input_dim] float32.  Returns [B, 1] float32."""
    B = batch.shape[0]
    x = batch.astype(jnp.float32)        # no-op if already f32; native layout

    full = lambda a: pl.BlockSpec(a.shape, lambda: (0,) * a.ndim)

    if "wblkt" in packed:                # static Python branch on num blocks
        kernel = functools.partial(_disc_kernel_blocks,
                                   clamp_magnitude=clamp_magnitude,
                                   bn_eps=bn_eps)
        args = (x, packed["w1t"], packed["head"],
                packed["wblkt"], packed["blk_rows"])
    else:
        kernel = functools.partial(_disc_kernel_noblocks,
                                   clamp_magnitude=clamp_magnitude)
        args = (x, packed["w1t"], packed["head"])

    return pl.pallas_call(
        kernel,
        out_shape=jax.ShapeDtypeStruct((B, 1), jnp.float32),
        in_specs=[full(a) for a in args],
        out_specs=pl.BlockSpec((B, 1), lambda: (0, 0)),
        compiler_params=pltpu.CompilerParams(
            vmem_limit_bytes=32 * 1024 * 1024),
    )(*args)


# ---------------------------------------------------------------------------
# Init + pure-JAX reference
# ---------------------------------------------------------------------------

def init_params(key, input_dim, hid_dim, num_layer_blocks):
    nb = num_layer_blocks - 1
    ks = jax.random.split(key, 6)
    s1 = 1.0 / jnp.sqrt(input_dim)
    sh = 1.0 / jnp.sqrt(hid_dim)
    return {
        "w1": jax.random.uniform(ks[0], (hid_dim, input_dim), jnp.float32,
                                 -s1, s1),
        "b1": jax.random.uniform(ks[1], (hid_dim,), jnp.float32, -s1, s1),
        "wblk": jax.random.uniform(ks[2], (nb, hid_dim, hid_dim), jnp.float32,
                                   -sh, sh),
        "bblk": jax.random.uniform(ks[3], (nb, hid_dim), jnp.float32, -sh, sh),
        "gamma": jnp.ones((nb, hid_dim), jnp.float32),   # BatchNorm affine init
        "beta": jnp.zeros((nb, hid_dim), jnp.float32),
        "wlast": jax.random.uniform(ks[4], (hid_dim,), jnp.float32, -sh, sh),
        "blast": jax.random.uniform(ks[5], (), jnp.float32, -sh, sh),
    }


def reference_forward(batch, params, clamp_magnitude=10.0, bn_eps=1e-5):
    h = batch @ params["w1"].T + params["b1"]
    for i in range(params["wblk"].shape[0]):
        z = h @ params["wblk"][i].T + params["bblk"][i]
        mean = jnp.mean(z, axis=0, keepdims=True)
        var = jnp.mean((z - mean) ** 2, axis=0, keepdims=True)
        zh = (z - mean) / jnp.sqrt(var + bn_eps)
        zh = zh * params["gamma"][i] + params["beta"][i]
        h = h + jax.nn.relu(zh)
    o = h @ params["wlast"].reshape(-1, 1) + params["blast"]
    return jnp.clip(o, -clamp_magnitude, clamp_magnitude)


# ---------------------------------------------------------------------------

if __name__ == "__main__":
    # Module-consistent small shapes: batch=8, input_dim=16, hid_dim=32,
    # default num_layer_blocks=2 (one residual block), use_bn=True.
    B, INPUT_DIM, HID_DIM, NUM_LAYER_BLOCKS = 8, 16, 32, 2

    key = jax.random.PRNGKey(0)
    kx, kp = jax.random.split(key)
    x = jax.random.normal(kx, (B, INPUT_DIM), jnp.float32)

    # --- default config: one residual block ---
    params = init_params(kp, INPUT_DIM, HID_DIM, NUM_LAYER_BLOCKS)
    packed = pack_params(params)              # once; reused across calls
    out = jax.block_until_ready(resnet_airl_disc_forward(x, packed))
    ref = reference_forward(x, params)
    assert out.shape == (B, 1)
    assert jnp.allclose(out, ref, atol=1e-4, rtol=1e-4)

    # --- num_layer_blocks == 1: exercises the block-free kernel variant ---
    params1 = init_params(kp, INPUT_DIM, HID_DIM, 1)
    packed1 = pack_params(params1)
    out1 = jax.block_until_ready(resnet_airl_disc_forward(x, packed1))
    ref1 = reference_forward(x, params1)
    assert out1.shape == (B, 1)
    assert jnp.allclose(out1, ref1, atol=1e-4, rtol=1e-4)

    print("KERNEL_OK")
</pallas_src>

<mosaic_0001>
module attributes {stable_mosaic.version = 11 : i64} {
  func.func @_disc_kernel_blocks(%arg0: memref<8x16xf32, #tpu.memory_space<vmem>>, %arg1: memref<16x32xf32, #tpu.memory_space<vmem>>, %arg2: memref<3x32xf32, #tpu.memory_space<vmem>>, %arg3: memref<1x32x32xf32, #tpu.memory_space<vmem>>, %arg4: memref<1x3x32xf32, #tpu.memory_space<vmem>>, %arg5: memref<8x1xf32, #tpu.memory_space<vmem>>) attributes {dimension_semantics = [], scalar_prefetch = 0 : i64, scratch_operands = 0 : i64, tpu.core_type = #tpu.core_type<tc>} {
    %c0 = arith.constant 0 : index
    %c0_0 = arith.constant 0 : index
    %0 = vector.load %arg2[%c0, %c0_0] : memref<3x32xf32, #tpu.memory_space<vmem>>, vector<3x32xf32>
    %1 = vector.extract_strided_slice %0 {offsets = [0, 0], sizes = [1, 32], strides = [1, 1]} : vector<3x32xf32> to vector<1x32xf32>
    %2 = vector.extract_strided_slice %0 {offsets = [1, 0], sizes = [1, 32], strides = [1, 1]} : vector<3x32xf32> to vector<1x32xf32>
    %3 = vector.extract_strided_slice %0 {offsets = [2, 0], sizes = [1, 1], strides = [1, 1]} : vector<3x32xf32> to vector<1x1xf32>
    %c0_1 = arith.constant 0 : index
    %c0_2 = arith.constant 0 : index
    %4 = vector.load %arg0[%c0_1, %c0_2] : memref<8x16xf32, #tpu.memory_space<vmem>>, vector<8x16xf32>
    %c0_3 = arith.constant 0 : index
    %c0_4 = arith.constant 0 : index
    %5 = vector.load %arg1[%c0_3, %c0_4] : memref<16x32xf32, #tpu.memory_space<vmem>>, vector<16x32xf32>
    %cst = arith.constant dense<0.000000e+00> : vector<8x32xf32>
    %6 = tpu.matmul %4, %5, %cst {dimension_numbers = #tpu.dot_dimension_numbers<[1], [0], [0], [1], [0, 0, 1, 1], [], []>} : vector<8x16xf32>, vector<16x32xf32>, vector<8x32xf32> -> vector<8x32xf32>
    %7 = vector.broadcast %1 : vector<1x32xf32> to vector<8x32xf32>
    %8 = arith.addf %6, %7 : vector<8x32xf32>
    %c0_5 = arith.constant 0 : index
    %c0_6 = arith.constant 0 : index
    %c0_7 = arith.constant 0 : index
    %9 = vector.load %arg4[%c0_5, %c0_6, %c0_7] : memref<1x3x32xf32, #tpu.memory_space<vmem>>, vector<1x3x32xf32>
    %10 = vector.shape_cast %9 : vector<1x3x32xf32> to vector<3x32xf32>
    %c0_8 = arith.constant 0 : index
    %c0_9 = arith.constant 0 : index
    %c0_10 = arith.constant 0 : index
    %11 = vector.load %arg3[%c0_8, %c0_9, %c0_10] : memref<1x32x32xf32, #tpu.memory_space<vmem>>, vector<1x32x32xf32>
    %12 = vector.shape_cast %11 : vector<1x32x32xf32> to vector<32x32xf32>
    %cst_11 = arith.constant dense<0.000000e+00> : vector<8x32xf32>
    %13 = tpu.matmul %8, %12, %cst_11 {dimension_numbers = #tpu.dot_dimension_numbers<[1], [0], [0], [1], [0, 0, 1, 1], [], []>} : vector<8x32xf32>, vector<32x32xf32>, vector<8x32xf32> -> vector<8x32xf32>
    %14 = vector.extract_strided_slice %10 {offsets = [0, 0], sizes = [1, 32], strides = [1, 1]} : vector<3x32xf32> to vector<1x32xf32>
    %15 = vector.broadcast %14 : vector<1x32xf32> to vector<8x32xf32>
    %16 = arith.addf %13, %15 : vector<8x32xf32>
    %cst_12 = arith.constant dense<0.000000e+00> : vector<32xf32>
    %17 = vector.multi_reduction <add>, %16, %cst_12 [0] : vector<8x32xf32> to vector<32xf32>
    %18 = vector.shape_cast %17 : vector<32xf32> to vector<1x32xf32>
    %cst_13 = arith.constant 1.250000e-01 : f32
    %19 = vector.broadcast %cst_13 : f32 to vector<1x32xf32>
    %20 = arith.mulf %18, %19 : vector<1x32xf32>
    %21 = vector.broadcast %20 : vector<1x32xf32> to vector<8x32xf32>
    %22 = arith.subf %16, %21 : vector<8x32xf32>
    %23 = arith.mulf %22, %22 : vector<8x32xf32>
    %cst_14 = arith.constant dense<0.000000e+00> : vector<32xf32>
    %24 = vector.multi_reduction <add>, %23, %cst_14 [0] : vector<8x32xf32> to vector<32xf32>
    %25 = vector.shape_cast %24 : vector<32xf32> to vector<1x32xf32>
    %cst_15 = arith.constant 1.250000e-01 : f32
    %26 = vector.broadcast %cst_15 : f32 to vector<1x32xf32>
    %27 = arith.mulf %25, %26 : vector<1x32xf32>
    %cst_16 = arith.constant 9.99999974E-6 : f32
    %28 = vector.broadcast %cst_16 : f32 to vector<1x32xf32>
    %29 = arith.addf %27, %28 : vector<1x32xf32>
    %30 = math.rsqrt %29 : vector<1x32xf32>
    %31 = vector.broadcast %30 : vector<1x32xf32> to vector<8x32xf32>
    %32 = arith.mulf %22, %31 : vector<8x32xf32>
    %33 = vector.extract_strided_slice %10 {offsets = [1, 0], sizes = [1, 32], strides = [1, 1]} : vector<3x32xf32> to vector<1x32xf32>
    %34 = vector.broadcast %33 : vector<1x32xf32> to vector<8x32xf32>
    %35 = arith.mulf %32, %34 : vector<8x32xf32>
    %36 = vector.extract_strided_slice %10 {offsets = [2, 0], sizes = [1, 32], strides = [1, 1]} : vector<3x32xf32> to vector<1x32xf32>
    %37 = vector.broadcast %36 : vector<1x32xf32> to vector<8x32xf32>
    %38 = arith.addf %35, %37 : vector<8x32xf32>
    %cst_17 = arith.constant 0.000000e+00 : f32
    %39 = vector.broadcast %cst_17 : f32 to vector<8x32xf32>
    %40 = arith.maximumf %38, %39 : vector<8x32xf32>
    %41 = arith.addf %8, %40 : vector<8x32xf32>
    %42 = vector.broadcast %2 : vector<1x32xf32> to vector<8x32xf32>
    %43 = arith.mulf %41, %42 : vector<8x32xf32>
    %cst_18 = arith.constant dense<0.000000e+00> : vector<8xf32>
    %44 = vector.multi_reduction <add>, %43, %cst_18 [1] : vector<8x32xf32> to vector<8xf32>
    %45 = vector.shape_cast %44 : vector<8xf32> to vector<8x1xf32>
    %46 = vector.broadcast %3 : vector<1x1xf32> to vector<8x1xf32>
    %47 = arith.addf %45, %46 : vector<8x1xf32>
    %cst_19 = arith.constant -1.000000e+01 : f32
    %cst_20 = arith.constant 1.000000e+01 : f32
    %48 = vector.broadcast %cst_19 : f32 to vector<8x1xf32>
    %49 = arith.maximumf %48, %47 : vector<8x1xf32>
    %50 = vector.broadcast %cst_20 : f32 to vector<8x1xf32>
    %51 = arith.minimumf %50, %49 : vector<8x1xf32>
    %c0_21 = arith.constant 0 : index
    %c0_22 = arith.constant 0 : index
    %52 = vector.load %arg5[%c0_21, %c0_22] : memref<8x1xf32, #tpu.memory_space<vmem>>, vector<8x1xf32>
    tpu.vector_store %arg5[%c0_21, %c0_22], %51 {strides = array<i32>} : memref<8x1xf32, #tpu.memory_space<vmem>>, vector<8x1xf32>,
    return
  }
}

</mosaic_0001>

<bundles_post_ra>
// kernel: tpu_custom_call.1
= control target key start
LH: loop header
LB: loop body
LE: loop exit
PB: predicated region body
PF: predicated region fallthrough
CT: control target
= control target key end

     0   :  { %10 = vsyncpa [#allocation3], 0  ;;  %s320_s0 = inlined_call_operand.hbm [shape: f32[8,16], index: 0, kind: input, shape index: {}]   ;;  %s321_s1 = inlined_call_operand.hbm [shape: f32[16,32], index: 1, kind: input, shape index: {}]   ;;  %s322_s2 = inlined_call_operand.vmem [shape: f32[3,32], index: 2, kind: input, shape index: {}]   ;;  %s323_s3 = inlined_call_operand.hbm [shape: f32[1,32,32], index: 3, kind: input, shape index: {}]   ;;  %s324_s4 = inlined_call_operand.vmem [shape: f32[1,3,32], index: 4, kind: input, shape index: {}]   ;;  %s325_s5 = inlined_call_operand.vmem [shape: f32[8,1], index: 5, kind: output, shape index: {}]  }
   0x1   :  { %11 = vsyncpa [#allocation5], 0  ;;  %s27_s20 = sshll.u32 %s321_s1, 4  ;;  %s263_s21 = smov [#allocation4]   ;;  %s28_s20 = int_to_ptr.hbm [resolvable:$true] %s27_s20 }
   0x2   :  { %s29_s22 = sshll.u32 %s263_s21, 4  ;;  %s17_s25 = sshll.u32 %s320_s0, 4  ;;  %s30_s22 = int_to_ptr.vmem [resolvable:$true] %s29_s22  ;;  %s18_s25 = int_to_ptr.hbm [resolvable:$true] %s17_s25 }
   0x3   :  { %s264_s26 = smov 128   ;;  %s265_s27 = smov 8  }
   0x4   :  { %35 = dma.hbm_to_vmem [thread:$0]  %s28_s20, 256, %s30_s22, [#allocation5], %s264_s26, %s264_s26, %s265_s27  }
   0x5   :  { %s266_s28 = smov [#allocation2]   ;;  %s42_s7 = sshll.u32 %s323_s3, 4  ;;  %s43_s7 = int_to_ptr.hbm [resolvable:$true] %s42_s7 }
   0x6   :  { %s19_s29 = sshll.u32 %s266_s28, 4  ;;  %s267_s1 = smov [#allocation6]   ;;  %s20_s29 = int_to_ptr.vmem [resolvable:$true] %s19_s29 }
   0x7   :  { %22 = dma.hbm_to_vmem [thread:$0]  %s18_s25, 128, %s20_s29, [#allocation3]  }
   0x8   :  { %s44_s8 = sshll.u32 %s267_s1, 4  ;;  %s45_s8 = int_to_ptr.vmem [resolvable:$true] %s44_s8 }
   0x9   :  { %50 = dma.hbm_to_vmem [thread:$0]  %s43_s7, 512, %s45_s8, [#allocation5], %s264_s26, %s264_s26, %s265_s27  }
   0xa   :  { %259 = dma.done.wait [#allocation3], 128  }
   0xb   :  { %260 = vsyncadd [#allocation3], 4294967168 }
   0xc   :  { %261 = dma.done.wait [#allocation5], 768  }
   0xd   :  { %262 = vsyncadd [#allocation5], 4294966528  ;;  %v68_v0 = vld [vmem:[#allocation4 + $0x8] sm:$0xff]  ;;  %v67_v1 = vld [vmem:[#allocation4] sm:$0xff]  ;;  %vm70_vm0 = vcmask 130048   ;;  %vm100_vm1 = vcmask 261120  }
   0xe   :  { %88 = vmatpush.msra.mxu0 %v68_v0  ;;  %v66_v2 = vld [vmem:[#allocation2] sm:$0xff]  ;;  %v98_v3 = vld [vmem:[#allocation6 + $0x18] sm:$0xff]  ;;  %v97_v4 = vld [vmem:[#allocation6 + $0x10] sm:$0xff]  ;;  %vm169_vm5 = vcmask 7168  }
   0xf   :  { %116 = vmatpush.msra.mxu1 %v98_v3  ;;  %v96_v5 = vld [vmem:[#allocation6 + $0x8] sm:$0xff]  ;;  %v95_v6 = vld [vmem:[#allocation6] sm:$0xff] }
  0x10   :  { %89 = vmatpush.msra.mxu0 %v67_v1  ;;  %v65_v7 = vld [vmem:[%s322_s2] sm:$0x7] }
  0x11   :  { %177 = vmatmul.msk.f32.vlgmr.msra.gmra.mxu0 %vm70_vm0, %v66_v2  ;;  %117 = vmatpush.msra.mxu1 %v97_v4  ;;  %v69_v8 = vperm.slane %v65_v7, 0  ;;  %v94_v11 = vld [vmem:[%s324_s4] sm:$0x7]  ;;  %v160_v47 = vperm.slane %v65_v7, 1  ;;  %v165_v51 = vperm.slane %v65_v7, 2 }
  0x12   :  { %v99_v12 = vperm.slane %v94_v11, 0  ;;  %v154_v40 = vperm.slane %v94_v11, 1  ;;  %v156_v43 = vperm.slane %v94_v11, 2 }
  0x13   :  { %118 = vmatpush.msra.mxu1 %v96_v5 }
  0x15   :  { %119 = vmatpush.msra.mxu1 %v95_v6 }
  0x8e   :  { %v91_v9 = vpop.f32.mrf.mxu0 }
  0x8f   :  { %v92_v10 = vadd.f32 %v91_v9, %v69_v8 }
  0x91   :  { %178 = vmatmul.msk.f32.vlgmr.msra.gmra.mxu1 %vm100_vm1, %v92_v10 }
 0x10e   :  { %v121_v13 = vpop.f32.mrf.mxu1 }
 0x10f   :  { %v122_v14 = vadd.f32 %v121_v13, %v99_v12 }
 0x111   :  { %v124_v15 = vsel %vm100_vm1, %v122_v14, 0.0 }
 0x112   :  { %v125_v16 = vrot.slane %v124_v15, 4 }
 0x114   :  { %v126_v17 = vadd.f32 %v125_v16, %v124_v15 }
 0x116   :  { %v127_v18 = vrot.slane %v126_v17, 2 }
 0x118   :  { %v128_v19 = vadd.f32 %v127_v18, %v126_v17 }
 0x11a   :  { %v129_v20 = vrot.slane %v128_v19, 1 }
 0x11c   :  { %v130_v21 = vadd.f32 %v129_v20, %v128_v19 }
 0x11e   :  { %v131_v22 = vmul.f32 0.125, %v130_v21 }
 0x120   :  { %v132_v23 = vsub.f32 %v122_v14, %v131_v22 }
 0x122   :  { %v133_v24 = vmul.f32 %v132_v23, %v132_v23 }
 0x124   :  { %v134_v25 = vsel %vm100_vm1, %v133_v24, 0.0 }
 0x125   :  { %v135_v26 = vrot.slane %v134_v25, 4 }
 0x127   :  { %v136_v27 = vadd.f32 %v135_v26, %v134_v25 }
 0x129   :  { %v137_v28 = vrot.slane %v136_v27, 2 }
 0x12b   :  { %v138_v29 = vadd.f32 %v137_v28, %v136_v27 }
 0x12d   :  { %v139_v30 = vrot.slane %v138_v29, 1 }
 0x12f   :  { %v140_v31 = vadd.f32 %v139_v30, %v138_v29 }
 0x131   :  { %v141_v32 = vmul.f32 0.125, %v140_v31 }
 0x133   :  { %v142_v33 = vadd.f32 1e-05, %v141_v32 }
 0x135   :  { %185 = vrsqrt.f32 %v142_v33  ;;  %vm149_vm3 = vweird.f32 %v142_v33 }
 0x13b   :  { %v186_v34 = vpop.eup %185 }
 0x13c   :  { %v144_v35 = vmul.f32 %v186_v34, %v142_v33  ;;  %vm150_vm2 = vweird.f32 %v186_v34 }
 0x13d   :  { %vm151_vm4 = vmor %vm149_vm3, %vm150_vm2 }
 0x13e   :  { %v145_v36 = vmul.f32 %v186_v34, %v144_v35 }
 0x140   :  { %v146_v37 = vmul.f32 0.5, %v145_v36 }
 0x142   :  { %v147_v38 = vsub.f32 1.5, %v146_v37 }
 0x144   :  { %v148_v39 = vmul.f32 %v186_v34, %v147_v38 }
 0x146   :  { %v152_v41 = vsel %vm151_vm4, %v186_v34, %v148_v39 }
 0x147   :  { %v153_v42 = vmul.f32 %v152_v41, %v132_v23 }
 0x149   :  { %v155_v44 = vmul.f32 %v154_v40, %v153_v42 }
 0x14b   :  { %v157_v45 = vadd.f32 %v156_v43, %v155_v44 }
 0x14d   :  { %v158_v46 = vmax.f32 %v157_v45, 0.0 }
 0x14f   :  { %v159_v48 = vadd.f32 %v158_v46, %v92_v10 }
 0x151   :  { %v161_v49 = vmul.f32 %v160_v47, %v159_v48 }
 0x153   :  { %v162_v50 = vsel %vm100_vm1, %v161_v49, 0.0 }
 0x154   :  { %163 = vadd.xlane.f32.xlu0 %v162_v50 }
 0x1c7   :  { %v164_v52 = vpop.xlane.xlu0 %163 }
 0x1c8   :  { %v166_v53 = vadd.f32 %v165_v51, %v164_v52 }
 0x1ca   :  { %v179_v54 = vclamps-f32 %v166_v53, 10.0 }
 0x1cc   :  { %170 = vst.msk [vmem:[%s325_s5] sm:$0xff] %vm169_vm5, %v179_v54 }
 0x1cd   :  { %175 = vsyncpa [#allocation3], 1 }
 0x1ce   :  { %176 = vsyncpa [#allocation5], 1 }

</bundles_post_ra>
